<compile_context>
chip_gen: v6e
topology: v6e:2x2x1
jax: 0.10.0
libtpu: 0.0.40
codegen_flags: <defaults>
</compile_context>

<pallas_src>
import functools

import jax
import jax.numpy as jnp
from jax.experimental import pallas as pl
from jax.experimental.pallas import tpu as pltpu

HIDDEN_DIM = 128
TRANSITION_SMOOTHNESS = 0.1
_NUM_COLS = 8  # packed column slab: [w1, b1, b2, b3, w4, pad, pad, pad]


def _round_up(x, m):
    return ((x + m - 1) // m) * m


def _schedule_kernel(cols_ref, w2_ref, w3_ref, scal_ref, t_ref, out_ref):
    """Fused MLP + sigmoid gating, batch on lanes.

    cols_ref: (H, 8)  f32  packed columns [w1, b1, b2, b3, w4, 0, 0, 0]
    w2_ref  : (H, H)  bf16 (PyTorch (out, in) layout; h_new = W @ h)
    w3_ref  : (H, H)  bf16
    scal_ref: SMEM (3,) = [b4, transition_point, 1/smoothness]
    t_ref   : (1, TB) f32 normalized time (lane-dense)
    out_ref : (1, TB) f32 adaptive weights
    """
    t = t_ref[...]                                                 # (1, TB)
    cols = cols_ref[...]                                           # (H, 8)
    w1 = cols[:, 0:1]
    b1 = cols[:, 1:2]
    b2 = cols[:, 2:3]
    b3 = cols[:, 3:4]
    w4 = cols[:, 4:5]

    # Layer 1: (B,1)@(1,H) degenerate matmul -> VPU outer product (kept off MXU).
    h = jnp.maximum(w1 * t + b1, 0.0)                              # (H, TB) f32

    # Layers 2 & 3: bf16 MXU matmuls with f32 accumulation; bias/ReLU in f32.
    h = jnp.maximum(
        jnp.dot(w2_ref[...], h.astype(jnp.bfloat16),
                preferred_element_type=jnp.float32) + b2, 0.0)
    h = jnp.maximum(
        jnp.dot(w3_ref[...], h.astype(jnp.bfloat16),
                preferred_element_type=jnp.float32) + b3, 0.0)

    # Layer 4: (H,)->1 projection as VPU multiply + sublane reduction (off MXU).
    b4 = scal_ref[0]
    logit = jnp.sum(w4 * h, axis=0, keepdims=True) + b4            # (1, TB)
    schedule_value = jax.nn.sigmoid(logit)

    tp = scal_ref[1]
    inv_smooth = scal_ref[2]
    transition_factor = jax.nn.sigmoid((tp - t) * inv_smooth)

    out_ref[...] = schedule_value * transition_factor


@functools.partial(jax.jit, static_argnames=("max_t", "tile_b"))
def learnable_convergence_schedule(t, params, max_t=1.0, tile_b=4096):
    """t: (B,) float32 times.  Returns (B,) adaptive weights."""
    t = jnp.asarray(t, jnp.float32).reshape(-1)
    B = t.shape[0]
    normalized_t = t / max_t

    w1, b1, w2, b2, w3, b3, w4, b4, tp = params
    H = w2.shape[0]

    # Batch tile selection (lane-dense):
    #  - large default (4096) amortizes per-grid-step overhead and the MXU
    #    weight push/drain for big batches while staying well inside scoped
    #    VMEM on all of v5e/v6e/v7x
    #  - whenever B_pad >= 256, force at least two tiles so the "parallel"
    #    batch axis has >= 2 blocks for v7x's two TensorCores
    b128 = _round_up(B, 128)
    if b128 >= 256:
        tb = min(int(tile_b), _round_up(-(-b128 // 2), 128))
    else:
        tb = b128
    B_pad = _round_up(B, tb)
    num_tiles = B_pad // tb
    t_lanes = jnp.zeros((1, B_pad), jnp.float32).at[0, :B].set(normalized_t)

    # Pack the five (H,1)/(H,) column operands into one (H, 8) slab -> single DMA.
    cols = jnp.zeros((H, _NUM_COLS), jnp.float32)
    cols = cols.at[:, 0].set(w1.reshape(H))
    cols = cols.at[:, 1].set(b1.reshape(H))
    cols = cols.at[:, 2].set(b2.reshape(H))
    cols = cols.at[:, 3].set(b3.reshape(H))
    cols = cols.at[:, 4].set(w4.reshape(H))

    # bf16 MXU operands: halves weight HBM->VMEM traffic, 2-3x MXU throughput.
    w2_bf = w2.astype(jnp.bfloat16)
    w3_bf = w3.astype(jnp.bfloat16)

    scalars = jnp.stack([
        jnp.reshape(b4, ()).astype(jnp.float32),
        jnp.reshape(tp, ()).astype(jnp.float32),
        jnp.float32(1.0 / TRANSITION_SMOOTHNESS),
    ])                                                             # (3,) in SMEM

    const = lambda i: (0, 0)   # weights stay VMEM-resident across grid steps

    out = pl.pallas_call(
        _schedule_kernel,
        out_shape=jax.ShapeDtypeStruct((1, B_pad), jnp.float32),
        grid=(num_tiles,),
        in_specs=[
            pl.BlockSpec((H, _NUM_COLS), const),         # packed columns
            pl.BlockSpec((H, H), const),                 # w2 (bf16)
            pl.BlockSpec((H, H), const),                 # w3 (bf16)
            pl.BlockSpec(memory_space=pltpu.SMEM),       # [b4, tp, 1/smooth]
            pl.BlockSpec((1, tb), lambda i: (0, i)),     # t tile (lane-dense)
        ],
        out_specs=pl.BlockSpec((1, tb), lambda i: (0, i)),
        compiler_params=pltpu.CompilerParams(
            dimension_semantics=("parallel",),           # shard across TCs on v7x
        ),
    )(cols, w2_bf, w3_bf, scalars, t_lanes)

    return out[0, :B]


def init_params(key, hidden_dim=HIDDEN_DIM):
    """Synthetic init mirroring PyTorch nn.Linear default init.

    Weight layout: W2/W3 kept in PyTorch (out, in) form so the kernel computes
    W @ h; W1 and W4 stored as (H, 1) columns for VPU broadcast.
    """
    keys = jax.random.split(key, 8)

    def lin(kw, kb, fan_in, w_shape, b_shape):
        bound = 1.0 / float(fan_in) ** 0.5
        w = jax.random.uniform(kw, w_shape, jnp.float32, -bound, bound)
        b = jax.random.uniform(kb, b_shape, jnp.float32, -bound, bound)
        return w, b

    H = hidden_dim
    w1, b1 = lin(keys[0], keys[1], 1, (H, 1), (H, 1))
    w2, b2 = lin(keys[2], keys[3], H, (H, H), (H, 1))
    w3, b3 = lin(keys[4], keys[5], H, (H, H), (H, 1))
    w4, b4 = lin(keys[6], keys[7], H, (H, 1), ())
    tp = jnp.float32(0.8)                    # self.transition_point
    return (w1, b1, w2, b2, w3, b3, w4, b4, tp)


def _reference(t, params, max_t=1.0):
    """Pure-JAX f32 reference of the PyTorch forward, for validation."""
    w1, b1, w2, b2, w3, b3, w4, b4, tp = params
    nt = (jnp.asarray(t, jnp.float32) / max_t).reshape(-1, 1)     # (B, 1)
    h = jax.nn.relu(nt @ w1.T + b1.T)
    h = jax.nn.relu(h @ w2.T + b2.T)
    h = jax.nn.relu(h @ w3.T + b3.T)
    sv = jax.nn.sigmoid(h @ w4 + b4)                              # (B, 1)
    tf = jax.nn.sigmoid((tp - nt) / TRANSITION_SMOOTHNESS)
    return (sv * tf).reshape(-1)


if __name__ == "__main__":
    key = jax.random.PRNGKey(0)
    pkey, tkey1, tkey2 = jax.random.split(key, 3)

    params = init_params(pkey)

    # Small batch (single tile, matches the module's typical usage).
    B = 8
    t_small = jax.random.uniform(tkey1, (B,), jnp.float32, 0.0, 1.0)
    out = jax.block_until_ready(learnable_convergence_schedule(t_small, params))
    ref = _reference(t_small, params)
    assert out.shape == (B,)
    # bf16 MXU inputs -> loosen tolerance vs the f32 reference.
    assert jnp.allclose(out, ref, atol=5e-3, rtol=2e-2), (out, ref)

    # Larger ragged batch exercising the multi-tile grid + padding path
    # (>= 2 grid steps so the "parallel" axis is actually sharded on v7x).
    B2 = 300
    t_big = jax.random.uniform(tkey2, (B2,), jnp.float32, 0.0, 1.0)
    out2 = jax.block_until_ready(learnable_convergence_schedule(t_big, params))
    ref2 = _reference(t_big, params)
    assert out2.shape == (B2,)
    assert jnp.allclose(out2, ref2, atol=5e-3, rtol=2e-2)

    # TODO(synk): PyTorch's `.item()` unwrap for 0-d results is host-side and
    # left to the caller.
    print("KERNEL_OK")
</pallas_src>

<mosaic_0001>
module attributes {stable_mosaic.version = 11 : i64} {
  func.func @_schedule_kernel(%arg0: i32, %arg1: memref<128x8xf32, #tpu.memory_space<vmem>>, %arg2: memref<128x128xbf16, #tpu.memory_space<vmem>>, %arg3: memref<128x128xbf16, #tpu.memory_space<vmem>>, %arg4: memref<3xf32, #tpu.memory_space<smem>>, %arg5: memref<1x128xf32, #tpu.memory_space<vmem>>, %arg6: memref<1x128xf32, #tpu.memory_space<vmem>>) attributes {dimension_semantics = [#tpu.dimension_semantics<parallel>], iteration_bounds = array<i64: 1>, scalar_prefetch = 0 : i64, scratch_operands = 0 : i64, tpu.core_type = #tpu.core_type<tc>, window_params = [{pipeline_mode = #tpu.pipeline_mode<synchronous>, transform_indices = @transform_0, window_bounds = array<i64: 128, 8>}, {pipeline_mode = #tpu.pipeline_mode<synchronous>, transform_indices = @transform_1, window_bounds = array<i64: 128, 128>}, {pipeline_mode = #tpu.pipeline_mode<synchronous>, transform_indices = @transform_2, window_bounds = array<i64: 128, 128>}, {transform_indices = @transform_3, window_bounds = array<i64: 3>}, {transform_indices = @transform_4, window_bounds = array<i64: 1, 128>}, {transform_indices = @transform_5, window_bounds = array<i64: 1, 128>}]} {
    %c0 = arith.constant 0 : index
    %c0_0 = arith.constant 0 : index
    %0 = vector.load %arg5[%c0, %c0_0] : memref<1x128xf32, #tpu.memory_space<vmem>>, vector<1x128xf32>
    %c0_1 = arith.constant 0 : index
    %c0_2 = arith.constant 0 : index
    %1 = vector.load %arg1[%c0_1, %c0_2] : memref<128x8xf32, #tpu.memory_space<vmem>>, vector<128x8xf32>
    %2 = vector.extract_strided_slice %1 {offsets = [0, 0], sizes = [128, 1], strides = [1, 1]} : vector<128x8xf32> to vector<128x1xf32>
    %3 = vector.extract_strided_slice %1 {offsets = [0, 1], sizes = [128, 1], strides = [1, 1]} : vector<128x8xf32> to vector<128x1xf32>
    %4 = vector.extract_strided_slice %1 {offsets = [0, 2], sizes = [128, 1], strides = [1, 1]} : vector<128x8xf32> to vector<128x1xf32>
    %5 = vector.extract_strided_slice %1 {offsets = [0, 3], sizes = [128, 1], strides = [1, 1]} : vector<128x8xf32> to vector<128x1xf32>
    %6 = vector.extract_strided_slice %1 {offsets = [0, 4], sizes = [128, 1], strides = [1, 1]} : vector<128x8xf32> to vector<128x1xf32>
    %7 = vector.broadcast %2 : vector<128x1xf32> to vector<128x128xf32>
    %8 = vector.broadcast %0 : vector<1x128xf32> to vector<128x128xf32>
    %9 = arith.mulf %7, %8 : vector<128x128xf32>
    %10 = vector.broadcast %3 : vector<128x1xf32> to vector<128x128xf32>
    %11 = arith.addf %9, %10 : vector<128x128xf32>
    %cst = arith.constant 0.000000e+00 : f32
    %12 = vector.broadcast %cst : f32 to vector<128x128xf32>
    %13 = arith.maximumf %11, %12 : vector<128x128xf32>
    %c0_3 = arith.constant 0 : index
    %c0_4 = arith.constant 0 : index
    %14 = vector.load %arg2[%c0_3, %c0_4] : memref<128x128xbf16, #tpu.memory_space<vmem>>, vector<128x128xbf16>
    %15 = arith.truncf %13 : vector<128x128xf32> to vector<128x128xbf16>
    %cst_5 = arith.constant dense<0.000000e+00> : vector<128x128xf32>
    %16 = tpu.matmul %14, %15, %cst_5 {dimension_numbers = #tpu.dot_dimension_numbers<[1], [0], [0], [1], [0, 0, 1, 1], [], []>} : vector<128x128xbf16>, vector<128x128xbf16>, vector<128x128xf32> -> vector<128x128xf32>
    %17 = vector.broadcast %4 : vector<128x1xf32> to vector<128x128xf32>
    %18 = arith.addf %16, %17 : vector<128x128xf32>
    %cst_6 = arith.constant 0.000000e+00 : f32
    %19 = vector.broadcast %cst_6 : f32 to vector<128x128xf32>
    %20 = arith.maximumf %18, %19 : vector<128x128xf32>
    %c0_7 = arith.constant 0 : index
    %c0_8 = arith.constant 0 : index
    %21 = vector.load %arg3[%c0_7, %c0_8] : memref<128x128xbf16, #tpu.memory_space<vmem>>, vector<128x128xbf16>
    %22 = arith.truncf %20 : vector<128x128xf32> to vector<128x128xbf16>
    %cst_9 = arith.constant dense<0.000000e+00> : vector<128x128xf32>
    %23 = tpu.matmul %21, %22, %cst_9 {dimension_numbers = #tpu.dot_dimension_numbers<[1], [0], [0], [1], [0, 0, 1, 1], [], []>} : vector<128x128xbf16>, vector<128x128xbf16>, vector<128x128xf32> -> vector<128x128xf32>
    %24 = vector.broadcast %5 : vector<128x1xf32> to vector<128x128xf32>
    %25 = arith.addf %23, %24 : vector<128x128xf32>
    %cst_10 = arith.constant 0.000000e+00 : f32
    %26 = vector.broadcast %cst_10 : f32 to vector<128x128xf32>
    %27 = arith.maximumf %25, %26 : vector<128x128xf32>
    %c0_11 = arith.constant 0 : index
    %28 = memref.load %arg4[%c0_11] : memref<3xf32, #tpu.memory_space<smem>>
    %29 = vector.broadcast %6 : vector<128x1xf32> to vector<128x128xf32>
    %30 = arith.mulf %29, %27 : vector<128x128xf32>
    %cst_12 = arith.constant dense<0.000000e+00> : vector<128xf32>
    %31 = vector.multi_reduction <add>, %30, %cst_12 [0] : vector<128x128xf32> to vector<128xf32>
    %32 = vector.shape_cast %31 : vector<128xf32> to vector<1x128xf32>
    %33 = vector.broadcast %28 : f32 to vector<1x128xf32>
    %34 = arith.addf %32, %33 : vector<1x128xf32>
    %35 = arith.negf %34 : vector<1x128xf32>
    %36 = math.exp %35 : vector<1x128xf32>
    %cst_13 = arith.constant 1.000000e+00 : f32
    %37 = vector.broadcast %cst_13 : f32 to vector<1x128xf32>
    %38 = arith.addf %37, %36 : vector<1x128xf32>
    %39 = arith.divf %37, %38 : vector<1x128xf32>
    %c1 = arith.constant 1 : index
    %40 = memref.load %arg4[%c1] : memref<3xf32, #tpu.memory_space<smem>>
    %c2 = arith.constant 2 : index
    %41 = memref.load %arg4[%c2] : memref<3xf32, #tpu.memory_space<smem>>
    %42 = vector.broadcast %40 : f32 to vector<1x128xf32>
    %43 = arith.subf %42, %0 : vector<1x128xf32>
    %44 = vector.broadcast %41 : f32 to vector<1x128xf32>
    %45 = arith.mulf %43, %44 : vector<1x128xf32>
    %46 = arith.negf %45 : vector<1x128xf32>
    %47 = math.exp %46 : vector<1x128xf32>
    %cst_14 = arith.constant 1.000000e+00 : f32
    %48 = vector.broadcast %cst_14 : f32 to vector<1x128xf32>
    %49 = arith.addf %48, %47 : vector<1x128xf32>
    %50 = arith.divf %48, %49 : vector<1x128xf32>
    %51 = arith.mulf %39, %50 : vector<1x128xf32>
    %c0_15 = arith.constant 0 : index
    %c0_16 = arith.constant 0 : index
    %52 = vector.load %arg6[%c0_15, %c0_16] : memref<1x128xf32, #tpu.memory_space<vmem>>, vector<1x128xf32>
    tpu.vector_store %arg6[%c0_15, %c0_16], %51 {strides = array<i32>} : memref<1x128xf32, #tpu.memory_space<vmem>>, vector<1x128xf32>,
    return
  }
  func.func @transform_0(%arg0: i32) -> (i32, i32) {
    %c0_i32 = arith.constant 0 : i32
    %c0_i32_0 = arith.constant 0 : i32
    %c0_i32_1 = arith.constant 0 : i32
    return %c0_i32, %c0_i32_0 : i32, i32
  }
  func.func @transform_1(%arg0: i32) -> (i32, i32) {
    %c0_i32 = arith.constant 0 : i32
    %c0_i32_0 = arith.constant 0 : i32
    %c0_i32_1 = arith.constant 0 : i32
    return %c0_i32, %c0_i32_0 : i32, i32
  }
  func.func @transform_2(%arg0: i32) -> (i32, i32) {
    %c0_i32 = arith.constant 0 : i32
    %c0_i32_0 = arith.constant 0 : i32
    %c0_i32_1 = arith.constant 0 : i32
    return %c0_i32, %c0_i32_0 : i32, i32
  }
  func.func @transform_3(%arg0: i32) -> i32 {
    %c0_i32 = arith.constant 0 : i32
    %c0_i32_0 = arith.constant 0 : i32
    return %c0_i32 : i32
  }
  func.func @transform_4(%arg0: i32) -> (i32, i32) {
    %c0_i32 = arith.constant 0 : i32
    %c0_i32_0 = arith.constant 0 : i32
    return %c0_i32, %arg0 : i32, i32
  }
  func.func @transform_5(%arg0: i32) -> (i32, i32) {
    %c0_i32 = arith.constant 0 : i32
    %c0_i32_0 = arith.constant 0 : i32
    return %c0_i32, %arg0 : i32, i32
  }
}

</mosaic_0001>

<bundles_post_ra>
// kernel: learnable_convergence_schedule.1
= control target key start
LH: loop header
LB: loop body
LE: loop exit
PB: predicated region body
PF: predicated region fallthrough
CT: control target
= control target key end

     0   :  { %10 = vsyncpa [#allocation3], 0  ;;  %s1401_s0 = inlined_call_operand.vmem [shape: f32[128,8], index: 0, kind: input, shape index: {}]   ;;  %s1402_s1 = inlined_call_operand.vmem [shape: bf16[128,128], index: 1, kind: input, shape index: {}]   ;;  %s1403_s2 = inlined_call_operand.vmem [shape: bf16[128,128], index: 2, kind: input, shape index: {}]   ;;  %s1404_s3 = inlined_call_operand.vmem [shape: f32[3], index: 3, kind: input, shape index: {}]   ;;  %s1405_s4 = inlined_call_operand.vmem [shape: f32[1,128], index: 4, kind: input, shape index: {}]   ;;  %s1406_s5 = inlined_call_operand.vmem [shape: f32[1,128], index: 5, kind: output, shape index: {}]  }
   0x1   :  { %s23_s20 = sshll.u32 %s1404_s3, 4  ;;  %s24_s20 = int_to_ptr.vmem [resolvable:$true] %s23_s20 }
   0x2   :  { %s1057_s21 = scalar_lea.vmem %s24_s20, 16  ;;  %p1062_p1 = scmp.lt.s32.totalorder %s24_s20, %s24_s20 }
   0x3   :  { %p1058_p0 = scmp.ne.s32.totalorder %s24_s20, %s1057_s21  ;;  %p1063_p2 = scmp.lt.s32.totalorder %s1057_s21, %s1057_s21 }
   0x5   :  { %p1064_p3 = por %p1063_p2, %p1062_p1 }
   0x7   :  { %p1065_p4 = pnand %p1064_p3, %p1058_p0 }
   0x9   :  { %1068 = shalt.err (!%p1065_p4)
}
   0xa   :  { %s1071_s22 = smov [#allocation2]  }
   0xb   :  { %26 = dma.vmem_to_smem %s24_s20, 16, %s1071_s22, [#allocation3]  }
   0xc   :  { %1069 = dma.done.wait [#allocation3], 16  }
   0xd   :  { %1070 = vsyncadd [#allocation3], 4294967280 }
   0xe   :  { %32 = sfence }
   0xf   :  { %v1113_v0 = vld [vmem:[%s1401_s0 + $0x70] sm:$0xff]  ;;  %v1118_v1 = vld [vmem:[%s1401_s0 + $0x60] sm:$0xff]  ;;  %v1072_v2 = vmov 1   ;;  %v1127_v3 = vld [vmem:[%s1401_s0 + $0x78] sm:$0xff]  ;;  %v1073_v7 = vmov 0   ;;  %v1074_v19 = vmov 2   ;;  %v132_v22 = vlaneseq }
  0x10   :  { %1000 = vset.pattern.permute.xlu0 %v1072_v2  ;;  %998 = vset.pattern.permute.xlu1 %v1072_v2  ;;  %v1132_v4 = vld [vmem:[%s1401_s0 + $0x40] sm:$0xff]  ;;  %v1144_v6 = vld [vmem:[%s1401_s0 + $0x68] sm:$0xff]  ;;  %v1154_v8 = vld [vmem:[%s1401_s0 + $0x50] sm:$0xff]  ;;  %s894_s6 = sld [smem:[#allocation2 + $0x2]] }
  0x11   :  { %210 = vperm.xlu1 %998, %v1113_v0   ;;  %202 = vperm.xlu0 %1000, %v1118_v1   ;;  %v1137_v5 = vld [vmem:[%s1401_s0 + $0x20] sm:$0xff]  ;;  %v1162_v9 = vld [vmem:[%s1401_s0 + $0x58] sm:$0xff]  ;;  %v1172_v10 = vld [vmem:[%s1401_s0 + $0x48] sm:$0xff]  ;;  %v133_v25 = vshrl.u32 %v132_v22, 7  ;;  %s747_s7 = sld [smem:[#allocation2]] }
  0x12   :  { %v1177_v11 = vld [vmem:[%s1401_s0 + $0x38] sm:$0xff]  ;;  %v1192_v13 = vld [vmem:[%s1401_s0 + $0x30] sm:$0xff]  ;;  %v1198_v14 = vld [vmem:[%s1401_s0] sm:$0xff] }
  0x13   :  { %v1187_v12 = vld [vmem:[%s1401_s0 + $0x18] sm:$0xff]  ;;  %v1210_v15 = vld [vmem:[%s1401_s0 + $0x28] sm:$0xff]  ;;  %v1218_v16 = vld [vmem:[%s1401_s0 + $0x10] sm:$0xff]  ;;  %v134_v26 = vsub.s32 0, %v133_v25 }
  0x14   :  { %v1227_v17 = vld [vmem:[%s1401_s0 + $0x8] sm:$0xff]  ;;  %v1033_v18 = vld [vmem:[%s1402_s1] sm:$0xff]  }
  0x15   :  { %214 = vperm.xlu1 %998, %v1127_v3   ;;  %186 = vperm.xlu0 %1000, %v1132_v4   ;;  %v1248_v29 = vld [vmem:[%s1405_s4] sm:$0x1] }
  0x16   :  { %944 = vmatprep.mubr.bf16.mxu0 %v1033_v18  ;;  %v1253_v30 = vrot.slane %v1248_v29, %v134_v26 }
  0x19   :  { %999 = vset.pattern.permute.xlu1 %v1073_v7  ;;  %170 = vperm.xlu0 %1000, %v1137_v5  }
  0x1a   :  { %118 = vperm.xlu1 %999, %v1144_v6  }
  0x1d   :  { %1009 = vset.pattern.permute.xlu0 %v1073_v7 }
  0x1e   :  { %1001 = vset.pattern.permute.xlu1 %v1072_v2  ;;  %123 = vperm.xlu0 %1009, %v1113_v0  }
  0x1f   :  { %206 = vperm.xlu1 %1001, %v1144_v6  }
  0x22   :  { %128 = vperm.xlu0 %1009, %v1127_v3  }
  0x23   :  { %1002 = vset.pattern.permute.xlu1 %v1073_v7 }
  0x24   :  { %103 = vperm.xlu1 %1002, %v1154_v8  }
  0x26   :  { %113 = vperm.xlu0 %1009, %v1118_v1  }
  0x28   :  { %1003 = vset.pattern.permute.xlu1 %v1072_v2 }
  0x29   :  { %194 = vperm.xlu1 %1003, %v1154_v8  }
  0x2a   :  { %108 = vperm.xlu0 %1009, %v1162_v9  }
  0x2d   :  { %198 = vperm.xlu1 %1003, %v1162_v9  }
  0x2e   :  { %93 = vperm.xlu0 %1009, %v1132_v4  }
  0x31   :  { %1004 = vset.pattern.permute.xlu1 %v1073_v7 }
  0x32   :  { %98 = vperm.xlu1 %1004, %v1172_v10   ;;  %88 = vperm.xlu0 %1009, %v1177_v11  }
  0x36   :  { %1005 = vset.pattern.permute.xlu1 %v1072_v2  ;;  %73 = vperm.xlu0 %1009, %v1137_v5  }
  0x37   :  { %190 = vperm.xlu1 %1005, %v1172_v10  }
  0x3a   :  { %68 = vperm.xlu0 %1009, %v1187_v12  }
  0x3b   :  { %1006 = vset.pattern.permute.xlu1 %v1073_v7 }
  0x3c   :  { %83 = vperm.xlu1 %1006, %v1192_v13  }
  0x3e   :  { %53 = vperm.xlu0 %1009, %v1198_v14  }
  0x40   :  { %1007 = vset.pattern.permute.xlu1 %v1072_v2 }
  0x41   :  { %178 = vperm.xlu1 %1007, %v1192_v13  }
  0x42   :  { %1014 = vset.pattern.permute.xlu0 %v1072_v2 }
  0x43   :  { %154 = vperm.xlu0 %1014, %v1198_v14  }
  0x45   :  { %182 = vperm.xlu1 %1007, %v1177_v11  }
  0x47   :  { %1017 = vset.pattern.permute.xlu0 %v1074_v19 }
  0x48   :  { %334 = vperm.xlu0 %1017, %v1127_v3  }
  0x49   :  { %1008 = vset.pattern.permute.xlu1 %v1073_v7 }
  0x4a   :  { %78 = vperm.xlu1 %1008, %v1210_v15  }
  0x4c   :  { %314 = vperm.xlu0 %1017, %v1154_v8  }
  0x4e   :  { %1010 = vset.pattern.permute.xlu1 %v1072_v2 }
  0x4f   :  { %174 = vperm.xlu1 %1010, %v1210_v15  }
  0x50   :  { %306 = vperm.xlu0 %1017, %v1132_v4  }
  0x53   :  { %1011 = vset.pattern.permute.xlu1 %v1073_v7 }
  0x54   :  { %63 = vperm.xlu1 %1011, %v1218_v16   ;;  %298 = vperm.xlu0 %1017, %v1192_v13  }
  0x58   :  { %1012 = vset.pattern.permute.xlu1 %v1072_v2  ;;  %290 = vperm.xlu0 %1017, %v1137_v5  }
  0x59   :  { %162 = vperm.xlu1 %1012, %v1218_v16  }
  0x5c   :  { %282 = vperm.xlu0 %1017, %v1218_v16  }
  0x5d   :  { %166 = vperm.xlu1 %1012, %v1187_v12  }
  0x60   :  { %274 = vperm.xlu0 %1017, %v1198_v14  }
  0x61   :  { %1013 = vset.pattern.permute.xlu1 %v1073_v7 }
  0x62   :  { %58 = vperm.xlu1 %1013, %v1227_v17  }
  0x66   :  { %1015 = vset.pattern.permute.xlu1 %v1072_v2 }
  0x67   :  { %158 = vperm.xlu1 %1015, %v1227_v17  }
  0x6b   :  { %1016 = vset.pattern.permute.xlu1 %v1074_v19 }
  0x6c   :  { %330 = vperm.xlu1 %1016, %v1113_v0  }
  0x70   :  { %322 = vperm.xlu1 %1016, %v1118_v1  }
  0x74   :  { %326 = vperm.xlu1 %1016, %v1144_v6  }
  0x78   :  { %318 = vperm.xlu1 %1016, %v1162_v9  }
  0x7c   :  { %310 = vperm.xlu1 %1016, %v1172_v10  }
  0x80   :  { %302 = vperm.xlu1 %1016, %v1177_v11  }
  0x84   :  { %294 = vperm.xlu1 %1016, %v1210_v15  }
  0x88   :  { %286 = vperm.xlu1 %1016, %v1187_v12  }
  0x8c   :  { %v211_v20 = vpop.permute.xlu1 %210  ;;  %v203_v21 = vpop.permute.xlu0 %202  ;;  %278 = vperm.xlu1 %1016, %v1227_v17  }
  0x90   :  { %v215_v23 = vpop.permute.xlu1 %214  ;;  %v187_v24 = vpop.permute.xlu0 %186 }
  0x94   :  { %v1243_v27 = vpop.permute.xlu0 %170 }
  0x95   :  { %v119_v28 = vpop.permute.xlu1 %118 }
  0x96   :  { %v150_v38 = vmul.f32 %v1253_v30, %v119_v28 }
  0x99   :  { %v124_v31 = vpop.permute.xlu0 %123 }
  0x9a   :  { %v151_v32 = vmul.f32 %v1253_v30, %v124_v31  ;;  %v207_v33 = vpop.permute.xlu1 %206 }
  0x9b   :  { %v230_v42 = vadd.f32 %v207_v33, %v150_v38 }
  0x9c   :  { %v231_v35 = vadd.f32 %v211_v20, %v151_v32 }
  0x9d   :  { %v129_v34 = vpop.permute.xlu0 %128  ;;  %v246_v50 = vmax.f32 %v230_v42, 0.0 }
  0x9e   :  { %v152_v36 = vmul.f32 %v1253_v30, %v129_v34  ;;  %v247_v41 = vmax.f32 %v231_v35, 0.0 }
  0x9f   :  { %v104_v37 = vpop.permute.xlu1 %103 }
  0xa0   :  { %v232_v39 = vadd.f32 %v215_v23, %v152_v36  ;;  %v147_v48 = vmul.f32 %v1253_v30, %v104_v37 }
  0xa1   :  { %v114_v40 = vpop.permute.xlu0 %113 }
  0xa2   :  { %v248_v43 = vmax.f32 %v232_v39, 0.0  ;;  %v149_v44 = vmul.f32 %v1253_v30, %v114_v40 }
  0xa4   :  { %v229_v45 = vadd.f32 %v203_v21, %v149_v44  ;;  %v195_v46 = vpop.permute.xlu1 %194  ;;  %v272_v47 = vpack.c.bf16 %v248_v43, %v247_v41 }
  0xa5   :  { %v109_v49 = vpop.permute.xlu0 %108  ;;  %v227_v53 = vadd.f32 %v195_v46, %v147_v48 }
  0xa6   :  { %v245_v51 = vmax.f32 %v229_v45, 0.0  ;;  %v148_v52 = vmul.f32 %v1253_v30, %v109_v49  ;;  %928 = vmatprep.subr.bf16.mxu0 %v272_v47 }
  0xa7   :  { %929 = vmatpush3.bf16.msra.mxu0 %v272_v47  ;;  %v243_v57 = vmax.f32 %v227_v53, 0.0 }
  0xa8   :  { %v199_v54 = vpop.permute.xlu1 %198  ;;  %v271_v55 = vpack.c.bf16 %v246_v50, %v245_v51 }
  0xa9   :  { %v228_v56 = vadd.f32 %v199_v54, %v148_v52  ;;  %v94_v59 = vpop.permute.xlu0 %93 }
  0xaa   :  { %930 = vmatprep.subr.bf16.mxu0 %v271_v55  ;;  %v145_v61 = vmul.f32 %v1253_v30, %v94_v59 }
  0xab   :  { %v244_v58 = vmax.f32 %v228_v56, 0.0  ;;  %931 = vmatpush3.bf16.msra.mxu0 %v271_v55 }
  0xac   :  { %v225_v63 = vadd.f32 %v187_v24, %v145_v61 }
  0xad   :  { %v270_v60 = vpack.c.bf16 %v244_v58, %v243_v57  ;;  %v99_v62 = vpop.permute.xlu1 %98  ;;  %v89_v23 = vpop.permute.xlu0 %88 }
  0xae   :  { %v146_v2 = vmul.f32 %v1253_v30, %v99_v62  ;;  %v241_v19 = vmax.f32 %v225_v63, 0.0  ;;  %v144_v26 = vmul.f32 %v1253_v30, %v89_v23  ;;  %v1039_v23 = vld [vmem:[%s1402_s1 + $0x30] sm:$0xff]  }
  0xaf   :  { %932 = vmatprep.subr.bf16.mxu0 %v270_v60 }
  0xb0   :  { %933 = vmatpush3.bf16.msra.mxu0 %v270_v60 }
  0xb1   :  { %v74_v24 = vpop.permute.xlu0 %73 }
  0xb2   :  { %v191_v7 = vpop.permute.xlu1 %190  ;;  %v141_v36 = vmul.f32 %v1253_v30, %v74_v24 }
  0xb3   :  { %v226_v18 = vadd.f32 %v191_v7, %v146_v2 }
  0xb4   :  { %v221_v39 = vadd.f32 %v1243_v27, %v141_v36 }
  0xb5   :  { %v242_v20 = vmax.f32 %v226_v18, 0.0  ;;  %v69_v47 = vpop.permute.xlu0 %68 }
  0xb6   :  { %v237_v43 = vmax.f32 %v221_v39, 0.0  ;;  %v140_v50 = vmul.f32 %v1253_v30, %v69_v47 }
  0xb7   :  { %v269_v21 = vpack.c.bf16 %v242_v20, %v241_v19  ;;  %v84_v22 = vpop.permute.xlu1 %83  ;;  %v1034_v19 = vld [vmem:[%s1402_s1 + $0x8] sm:$0xff]   ;;  %v1035_v20 = vld [vmem:[%s1402_s1 + $0x10] sm:$0xff]  }
  0xb8   :  { %v143_v28 = vmul.f32 %v1253_v30, %v84_v22  ;;  %v1038_v22 = vld [vmem:[%s1402_s1 + $0x28] sm:$0xff]  }
  0xb9   :  { %934 = vmatprep.subr.bf16.mxu0 %v269_v21  ;;  %v54_v52 = vpop.permute.xlu0 %53 }
  0xba   :  { %935 = vmatpush3.bf16.msra.mxu0 %v269_v21  ;;  %v137_v56 = vmul.f32 %v1253_v30, %v54_v52  ;;  %v1037_v21 = vld [vmem:[%s1402_s1 + $0x20] sm:$0xff]  }
  0xbc   :  { %v179_v25 = vpop.permute.xlu1 %178 }
  0xbd   :  { %v223_v31 = vadd.f32 %v179_v25, %v143_v28  ;;  %v1040_v25 = vld [vmem:[%s1402_s1 + $0x38] sm:$0xff]   ;;  %v1075_v28 = vmov 3  }
  0xbe   :  { %v155_v59 = vpop.permute.xlu0 %154  ;;  %1018 = vset.pattern.permute.xlu1 %v1075_v28 }
  0xbf   :  { %v239_v34 = vmax.f32 %v223_v31, 0.0  ;;  %v217_v60 = vadd.f32 %v155_v59, %v137_v56  ;;  %527 = vperm.xlu1 %1018, %v1227_v17   ;;  %v1076_v31 = vmov 4  }
  0xc0   :  { %v183_v32 = vpop.permute.xlu1 %182  ;;  %1020 = vset.pattern.permute.xlu0 %v1076_v31 }
  0xc1   :  { %v224_v33 = vadd.f32 %v183_v32, %v144_v26  ;;  %v233_v2 = vmax.f32 %v217_v60, 0.0  ;;  %v1041_v26 = vld [vmem:[%s1403_s2] sm:$0xff]   ;;  %753 = vperm.xlu0 %1020, %v1227_v17  }
  0xc2   :  { %976 = vmatprep.mubr.bf16.mxu1 %v1041_v26 }
  0xc3   :  { %v240_v35 = vmax.f32 %v224_v33, 0.0  ;;  %531 = vperm.xlu1 %1018, %v1218_v16   ;;  %v335_v33 = vpop.permute.xlu0 %334 }
  0xc5   :  { %v268_v37 = vpack.c.bf16 %v240_v35, %v239_v34  ;;  %v79_v38 = vpop.permute.xlu1 %78  ;;  %765 = vperm.xlu0 %1020, %v1137_v5  }
  0xc6   :  { %v142_v40 = vmul.f32 %v1253_v30, %v79_v38 }
  0xc7   :  { %936 = vmatprep.subr.bf16.mxu0 %v268_v37  ;;  %1019 = vset.pattern.permute.xlu1 %v1076_v31  ;;  %v315_v36 = vpop.permute.xlu0 %314 }
  0xc8   :  { %937 = vmatpush3.bf16.msra.mxu0 %v268_v37  ;;  %749 = vperm.xlu1 %1019, %v1198_v14  }
  0xc9   :  { %777 = vperm.xlu0 %1020, %v1177_v11  }
  0xca   :  { %v175_v41 = vpop.permute.xlu1 %174 }
  0xcb   :  { %v222_v42 = vadd.f32 %v175_v41, %v142_v40  ;;  %v307_v40 = vpop.permute.xlu0 %306 }
  0xcc   :  { %1021 = vset.pattern.permute.xlu1 %v1075_v28 }
  0xcd   :  { %v238_v44 = vmax.f32 %v222_v42, 0.0  ;;  %539 = vperm.xlu1 %1021, %v1137_v5   ;;  %789 = vperm.xlu0 %1020, %v1154_v8  }
  0xcf   :  { %v267_v45 = vpack.c.bf16 %v238_v44, %v237_v43  ;;  %v64_v46 = vpop.permute.xlu1 %63 }
  0xd0   :  { %v139_v49 = vmul.f32 %v1253_v30, %v64_v46 }
  0xd1   :  { %938 = vmatprep.subr.bf16.mxu0 %v267_v45  ;;  %1022 = vset.pattern.permute.xlu1 %v1076_v31 }
  0xd2   :  { %939 = vmatpush3.bf16.msra.mxu0 %v267_v45  ;;  %757 = vperm.xlu1 %1022, %v1218_v16  }
  0xd3   :  { %1028 = vset.pattern.permute.xlu0 %v1075_v28 }
  0xd4   :  { %v163_v48 = vpop.permute.xlu1 %162  ;;  %523 = vperm.xlu0 %1028, %v1198_v14  }
  0xd5   :  { %v219_v51 = vadd.f32 %v163_v48, %v139_v49 }
  0xd6   :  { %761 = vperm.xlu1 %1022, %v1187_v12  }
  0xd7   :  { %v235_v54 = vmax.f32 %v219_v51, 0.0 }
  0xd8   :  { %v167_v53 = vpop.permute.xlu1 %166  ;;  %535 = vperm.xlu0 %1028, %v1187_v12  }
  0xd9   :  { %v220_v27 = vadd.f32 %v167_v53, %v140_v50 }
  0xda   :  { %1023 = vset.pattern.permute.xlu1 %v1075_v28 }
  0xdb   :  { %v236_v55 = vmax.f32 %v220_v27, 0.0  ;;  %547 = vperm.xlu1 %1023, %v1192_v13  }
  0xdc   :  { %543 = vperm.xlu0 %1028, %v1210_v15  }
  0xdd   :  { %v266_v57 = vpack.c.bf16 %v236_v55, %v235_v54  ;;  %v59_v58 = vpop.permute.xlu1 %58 }
  0xde   :  { %v138_v61 = vmul.f32 %v1253_v30, %v59_v58  ;;  %v1036_v30 = vld [vmem:[%s1402_s1 + $0x18] sm:$0xff]  }
  0xdf   :  { %940 = vmatprep.subr.bf16.mxu0 %v266_v57  ;;  %551 = vperm.xlu1 %1023, %v1177_v11  }
  0xe0   :  { %941 = vmatpush3.bf16.msra.mxu0 %v266_v57  ;;  %555 = vperm.xlu0 %1028, %v1132_v4  }
  0xe2   :  { %v159_v62 = vpop.permute.xlu1 %158 }
  0xe3   :  { %v218_v63 = vadd.f32 %v159_v62, %v138_v61  ;;  %1024 = vset.pattern.permute.xlu1 %v1076_v31 }
  0xe4   :  { %769 = vperm.xlu1 %1024, %v1210_v15   ;;  %567 = vperm.xlu0 %1028, %v1162_v9  }
  0xe5   :  { %v234_v7 = vmax.f32 %v218_v63, 0.0 }
  0xe7   :  { %v265_v18 = vpack.c.bf16 %v234_v7, %v233_v2  ;;  %v331_v5 = vpop.permute.xlu1 %330 }
  0xe8   :  { %773 = vperm.xlu1 %1024, %v1192_v13   ;;  %579 = vperm.xlu0 %1028, %v1113_v0  }
  0xe9   :  { %942 = vmatprep.subr.bf16.mxu0 %v265_v18 }
  0xea   :  { %943 = vmatpush3.bf16.msra.mxu0 %v265_v18 }
  0xeb   :  { %v323_v14 = vpop.permute.xlu1 %322 }
  0xec   :  { %1025 = vset.pattern.permute.xlu1 %v1075_v28  ;;  %1031 = vset.pattern.permute.xlu0 %v1076_v31 }
  0xed   :  { %945 = vmatmul.mubr.bf16.vlgmr.msra.gmra.mxu0 %v1034_v19  ;;  %559 = vperm.xlu1 %1025, %v1172_v10  }
  0xee   :  { %948 = vmatprep.mubr.bf16.mxu0 %v1035_v20  ;;  %801 = vperm.xlu0 %1031, %v1144_v6  }
  0xef   :  { %v327_v17 = vpop.permute.xlu1 %326 }
  0xf1   :  { %563 = vperm.xlu1 %1025, %v1154_v8  }
  0xf5   :  { %949 = vmatmul.mubr.bf16.gmra.mxu0 %v1036_v30  ;;  %1026 = vset.pattern.permute.xlu1 %v1076_v31 }
  0xf6   :  { %952 = vmatprep.mubr.bf16.mxu0 %v1037_v21  ;;  %781 = vperm.xlu1 %1026, %v1132_v4   ;;  %v319_v4 = vpop.permute.xlu1 %318 }
  0xfa   :  { %785 = vperm.xlu1 %1026, %v1172_v10   ;;  %v311_v38 = vpop.permute.xlu1 %310 }
  0xfd   :  { %953 = vmatmul.mubr.bf16.gmra.mxu0 %v1038_v22 }
  0xfe   :  { %956 = vmatprep.mubr.bf16.mxu0 %v1039_v23  ;;  %1027 = vset.pattern.permute.xlu1 %v1075_v28 }
  0xff   :  { %571 = vperm.xlu1 %1027, %v1118_v1  }
 0x103   :  { %575 = vperm.xlu1 %1027, %v1144_v6   ;;  %v303_v6 = vpop.permute.xlu1 %302 }
 0x105   :  { %957 = vmatmul.mubr.bf16.gmra.mxu0 %v1040_v25 }
 0x107   :  { %1029 = vset.pattern.permute.xlu1 %v1076_v31  ;;  %v295_v56 = vpop.permute.xlu1 %294 }
 0x108   :  { %793 = vperm.xlu1 %1029, %v1162_v9   ;;  %v299_v9 = vpop.permute.xlu0 %298 }
 0x10b   :  { %v287_v7 = vpop.permute.xlu1 %286 }
 0x10c   :  { %797 = vperm.xlu1 %1029, %v1118_v1   ;;  %v291_v59 = vpop.permute.xlu0 %290 }
 0x10f   :  { %v279_v26 = vpop.permute.xlu1 %278 }
 0x110   :  { %1030 = vset.pattern.permute.xlu1 %v1075_v28  ;;  %v283_v30 = vpop.permute.xlu0 %282 }
 0x111   :  { %583 = vperm.xlu1 %1030, %v1127_v3  }
 0x115   :  { %1032 = vset.pattern.permute.xlu1 %v1076_v31  ;;  %v275_v31 = vpop.permute.xlu0 %274 }
 0x116   :  { %805 = vperm.xlu1 %1032, %v1113_v0  }
 0x11a   :  { %809 = vperm.xlu1 %1032, %v1127_v3  }
 0x1ad   :  { %v1335_v11 = vpop.f32.mrf.mxu0 }
 0x1ae   :  { %v428_v3 = vadd.f32 %v1335_v11, %v283_v30  ;;  %v1042_v11 = vld [vmem:[%s1403_s2 + $0x8] sm:$0xff]  }
 0x1af   :  { %v1337_v12 = vpop.f32.mrf.mxu0 }
 0x1b1   :  { %v1340_v13 = vpop.f32.mrf.mxu0 }
 0x1b2   :  { %v431_v22 = vadd.f32 %v1340_v13, %v287_v7 }
 0x1b3   :  { %v1343_v15 = vpop.f32.mrf.mxu0 }
 0x1b5   :  { %v950_v16 = vpop.f32.mrf.mxu0 }
 0x1b6   :  { %v444_v63 = vadd.f32 %v950_v16, %v299_v9 }
 0x1b7   :  { %v1346_v8 = vpop.f32.mrf.mxu0 }
 0x1b8   :  { %v488_v0 = vmax.f32 %v444_v63, 0.0  ;;  %v436_v21 = vadd.f32 %v1346_v8, %v291_v59  ;;  %v420_v8 = vadd.f32 %v1337_v12, %v275_v31  ;;  %v1044_v12 = vld [vmem:[%s1403_s2 + $0x18] sm:$0xff]  }
 0x1b9   :  { %v951_v32 = vpop.f32.mrf.mxu0 }
 0x1ba   :  { %v447_v60 = vadd.f32 %v951_v32, %v303_v6  ;;  %v486_v28 = vmax.f32 %v436_v21, 0.0  ;;  %v754_v6 = vpop.permute.xlu0 %753 }
 0x1bb   :  { %v438_v24 = vpop.f32.mrf.mxu0 }
 0x1bc   :  { %v489_v18 = vmax.f32 %v447_v60, 0.0  ;;  %v439_v19 = vadd.f32 %v438_v24, %v295_v56 }
 0x1bd   :  { %v954_v34 = vpop.f32.mrf.mxu0 }
 0x1be   :  { %v460_v51 = vadd.f32 %v954_v34, %v315_v36  ;;  %v517_v23 = vpack.c.bf16 %v489_v18, %v488_v0  ;;  %v487_v25 = vmax.f32 %v439_v19, 0.0  ;;  %v1045_v34 = vld [vmem:[%s1403_s2 + $0x20] sm:$0xff]   ;;  %v1048_v36 = vld [vmem:[%s1403_s2 + $0x38] sm:$0xff]  }
 0x1bf   :  { %v451_v35 = vpop.f32.mrf.mxu0 }
 0x1c0   :  { %v492_v57 = vmax.f32 %v460_v51, 0.0  ;;  %v452_v58 = vadd.f32 %v451_v35, %v307_v40  ;;  %v516_v16 = vpack.c.bf16 %v487_v25, %v486_v28  ;;  %v1047_v35 = vld [vmem:[%s1403_s2 + $0x30] sm:$0xff]  }
 0x1c1   :  { %v955_v37 = vpop.f32.mrf.mxu0 }
 0x1c2   :  { %v463_v47 = vadd.f32 %v955_v37, %v319_v4  ;;  %v490_v2 = vmax.f32 %v452_v58, 0.0  ;;  %v1046_v4 = vld [vmem:[%s1403_s2 + $0x28] sm:$0xff]   ;;  %v528_v37 = vpop.permute.xlu1 %527 }
 0x1c3   :  { %v454_v10 = vpop.f32.mrf.mxu0 }
 0x1c4   :  { %v493_v1 = vmax.f32 %v463_v47, 0.0  ;;  %v455_v54 = vadd.f32 %v454_v10, %v311_v38  ;;  %v766_v47 = vpop.permute.xlu0 %765 }
 0x1c5   :  { %v958_v39 = vpop.f32.mrf.mxu0 }
 0x1c6   :  { %v476_v42 = vadd.f32 %v958_v39, %v331_v5  ;;  %v519_v61 = vpack.c.bf16 %v493_v1, %v492_v57  ;;  %v491_v62 = vmax.f32 %v455_v54, 0.0  ;;  %v485_v5 = vmax.f32 %v431_v22, 0.0  ;;  %v532_v10 = vpop.permute.xlu1 %531 }
 0x1c7   :  { %v467_v41 = vpop.f32.mrf.mxu0 }
 0x1c8   :  { %v468_v44 = vadd.f32 %v467_v41, %v323_v14  ;;  %v496_v48 = vmax.f32 %v476_v42, 0.0  ;;  %v518_v20 = vpack.c.bf16 %v491_v62, %v490_v2  ;;  %v423_v14 = vadd.f32 %v1343_v15, %v279_v26  ;;  %v1043_v15 = vld [vmem:[%s1403_s2 + $0x10] sm:$0xff]   ;;  %s893_s2 = sld [smem:[#allocation2 + $0x1]] }
 0x1c9   :  { %v959_v43 = vpop.f32.mrf.mxu0 }
 0x1ca   :  { %v479_v45 = vadd.f32 %v959_v43, %v335_v33  ;;  %v494_v52 = vmax.f32 %v468_v44, 0.0  ;;  %v483_v13 = vmax.f32 %v423_v14, 0.0  ;;  %v482_v33 = vmax.f32 %v420_v8, 0.0  ;;  %v750_v38 = vpop.permute.xlu1 %749 }
 0x1cb   :  { %v470_v46 = vpop.f32.mrf.mxu0 }
 0x1cc   :  { %v497_v49 = vmax.f32 %v479_v45, 0.0  ;;  %v471_v50 = vadd.f32 %v470_v46, %v327_v17  ;;  %v484_v17 = vmax.f32 %v428_v3, 0.0  ;;  %v514_v24 = vpack.c.bf16 %v483_v13, %v482_v33 }
 0x1ce   :  { %v495_v53 = vmax.f32 %v471_v50, 0.0  ;;  %v521_v27 = vpack.c.bf16 %v497_v49, %v496_v48  ;;  %v515_v32 = vpack.c.bf16 %v485_v5, %v484_v17  ;;  %v540_v39 = vpop.permute.xlu1 %539  ;;  %v778_v49 = vpop.permute.xlu0 %777 }
 0x1d0   :  { %v520_v55 = vpack.c.bf16 %v495_v53, %v494_v52  ;;  %960 = vmatprep.subr.bf16.mxu1 %v521_v27 }
 0x1d1   :  { %961 = vmatpush3.bf16.msra.mxu1 %v521_v27 }
 0x1d2   :  { %962 = vmatprep.subr.bf16.mxu1 %v520_v55  ;;  %v758_v40 = vpop.permute.xlu1 %757  ;;  %v1385_v9 = vpop.permute.xlu0 %789 }
 0x1d5   :  { %963 = vmatpush3.bf16.msra.mxu1 %v520_v55 }
 0x1d6   :  { %964 = vmatprep.subr.bf16.mxu1 %v519_v61  ;;  %v762_v41 = vpop.permute.xlu1 %761  ;;  %v524_v52 = vpop.permute.xlu0 %523 }
 0x1d9   :  { %965 = vmatpush3.bf16.msra.mxu1 %v519_v61 }
 0x1da   :  { %966 = vmatprep.subr.bf16.mxu1 %v518_v20  ;;  %v548_v42 = vpop.permute.xlu1 %547  ;;  %v536_v55 = vpop.permute.xlu0 %535 }
 0x1dd   :  { %967 = vmatpush3.bf16.msra.mxu1 %v518_v20 }
 0x1de   :  { %968 = vmatprep.subr.bf16.mxu1 %v517_v23  ;;  %v552_v43 = vpop.permute.xlu1 %551  ;;  %v544_v18 = vpop.permute.xlu0 %543 }
 0x1e1   :  { %969 = vmatpush3.bf16.msra.mxu1 %v517_v23 }
 0x1e2   :  { %970 = vmatprep.subr.bf16.mxu1 %v516_v16  ;;  %v770_v44 = vpop.permute.xlu1 %769  ;;  %v556_v8 = vpop.permute.xlu0 %555 }
 0x1e5   :  { %971 = vmatpush3.bf16.msra.mxu1 %v516_v16 }
 0x1e6   :  { %972 = vmatprep.subr.bf16.mxu1 %v515_v32  ;;  %v774_v45 = vpop.permute.xlu1 %773 }
 0x1e9   :  { %973 = vmatpush3.bf16.msra.mxu1 %v515_v32 }
 0x1ea   :  { %974 = vmatprep.subr.bf16.mxu1 %v514_v24  ;;  %v560_v46 = vpop.permute.xlu1 %559 }
 0x1ed   :  { %975 = vmatpush3.bf16.msra.mxu1 %v514_v24 }
 0x1ee   :  { %v564_v48 = vpop.permute.xlu1 %563 }
 0x1f0   :  { %977 = vmatmul.mubr.bf16.vlgmr.msra.gmra.mxu1 %v1042_v11 }
 0x1f1   :  { %980 = vmatprep.mubr.bf16.mxu1 %v1043_v15 }
 0x1f2   :  { %v782_v50 = vpop.permute.xlu1 %781 }
 0x1f6   :  { %v1387_v51 = vpop.permute.xlu1 %785 }
 0x1f8   :  { %981 = vmatmul.mubr.bf16.gmra.mxu1 %v1044_v12 }
 0x1f9   :  { %984 = vmatprep.mubr.bf16.mxu1 %v1045_v34 }
 0x1fa   :  { %v1389_v27 = vpop.permute.xlu1 %571 }
 0x1fe   :  { %v1391_v59 = vpop.permute.xlu1 %575 }
 0x200   :  { %985 = vmatmul.mubr.bf16.gmra.mxu1 %v1046_v4 }
 0x201   :  { %988 = vmatprep.mubr.bf16.mxu1 %v1047_v35 }
 0x202   :  { %v794_v23 = vpop.permute.xlu1 %793 }
 0x206   :  { %v798_v12 = vpop.permute.xlu1 %797 }
 0x208   :  { %989 = vmatmul.mubr.bf16.gmra.mxu1 %v1048_v36 }
 0x2b0   :  { %v978_v53 = vpop.f32.mrf.mxu1 }
 0x2b1   :  { %v677_v57 = vadd.f32 %v978_v53, %v532_v10 }
 0x2b2   :  { %v668_v1 = vpop.f32.mrf.mxu1 }
 0x2b3   :  { %v669_v54 = vadd.f32 %v668_v1, %v524_v52  ;;  %v733_v2 = vmax.f32 %v677_v57, 0.0 }
 0x2b4   :  { %v979_v56 = vpop.f32.mrf.mxu1 }
 0x2b5   :  { %v731_v60 = vmax.f32 %v669_v54, 0.0  ;;  %v680_v61 = vadd.f32 %v979_v56, %v536_v55  ;;  %v814_v25 = vmul.f32 %v758_v40, %v733_v2 }
 0x2b6   :  { %v671_v58 = vpop.f32.mrf.mxu1 }
 0x2b7   :  { %v672_v62 = vadd.f32 %v671_v58, %v528_v37  ;;  %v812_v20 = vmul.f32 %v750_v38, %v731_v60  ;;  %v734_v30 = vmax.f32 %v680_v61, 0.0 }
 0x2b8   :  { %v982_v63 = vpop.f32.mrf.mxu1 }
 0x2b9   :  { %v732_v7 = vmax.f32 %v672_v62, 0.0  ;;  %v693_v3 = vadd.f32 %v982_v63, %v548_v42  ;;  %v815_v5 = vmul.f32 %v762_v41, %v734_v30  ;;  %v568_v41 = vpop.permute.xlu0 %567 }
 0x2ba   :  { %v684_v19 = vpop.f32.mrf.mxu1 }
 0x2bb   :  { %v813_v0 = vmul.f32 %v754_v6, %v732_v7  ;;  %v685_v21 = vadd.f32 %v684_v19, %v540_v39  ;;  %v737_v13 = vmax.f32 %v693_v3, 0.0 }
 0x2bc   :  { %v983_v22 = vpop.f32.mrf.mxu1 }
 0x2bd   :  { %v828_v26 = vadd.f32 %v813_v0, %v812_v20  ;;  %v735_v28 = vmax.f32 %v685_v21, 0.0  ;;  %v696_v16 = vadd.f32 %v983_v22, %v552_v43  ;;  %v818_v10 = vmul.f32 %v774_v45, %v737_v13  ;;  %v580_v61 = vpop.permute.xlu0 %579 }
 0x2be   :  { %v687_v31 = vpop.f32.mrf.mxu1 }
 0x2bf   :  { %v829_v14 = vadd.f32 %v828_v26, %v814_v25  ;;  %v688_v17 = vadd.f32 %v687_v31, %v544_v18  ;;  %v816_v33 = vmul.f32 %v766_v47, %v735_v28  ;;  %v738_v4 = vmax.f32 %v696_v16, 0.0  ;;  %v584_v47 = vpop.permute.xlu1 %583 }
 0x2c0   :  { %v986_v32 = vpop.f32.mrf.mxu1 }
 0x2c1   :  { %v830_v24 = vadd.f32 %v829_v14, %v815_v5  ;;  %v736_v11 = vmax.f32 %v688_v17, 0.0  ;;  %v709_v39 = vadd.f32 %v986_v32, %v564_v48  ;;  %v819_v43 = vmul.f32 %v778_v49, %v738_v4  ;;  %v802_v0 = vpop.permute.xlu0 %801 }
 0x2c2   :  { %v700_v15 = vpop.f32.mrf.mxu1  ;;  %v859_v5 = vstv %s893_s2 }
 0x2c3   :  { %v831_v34 = vadd.f32 %v830_v24, %v816_v33  ;;  %v817_v35 = vmul.f32 %v770_v44, %v736_v11  ;;  %v701_v36 = vadd.f32 %v700_v15, %v556_v8  ;;  %v741_v54 = vmax.f32 %v709_v39, 0.0  ;;  %v806_v7 = vpop.permute.xlu1 %805 }
 0x2c4   :  { %v987_v37 = vpop.f32.mrf.mxu1  ;;  %v860_v17 = vsub.f32 %v859_v5, %v1248_v29  ;;  %v861_v8 = vstv %s894_s6 }
 0x2c5   :  { %v832_v38 = vadd.f32 %v831_v34, %v817_v35  ;;  %v739_v40 = vmax.f32 %v701_v36, 0.0  ;;  %v712_v52 = vadd.f32 %v987_v37, %v568_v41  ;;  %v822_v49 = vmul.f32 %v1385_v9, %v741_v54 }
 0x2c6   :  { %v703_v42 = vpop.f32.mrf.mxu1  ;;  %v862_v13 = vmul.f32 %v861_v8, %v860_v17 }
 0x2c7   :  { %v833_v6 = vadd.f32 %v832_v38, %v818_v10  ;;  %v704_v53 = vadd.f32 %v703_v42, %v560_v46  ;;  %v820_v55 = vmul.f32 %v782_v50, %v739_v40  ;;  %v742_v60 = vmax.f32 %v712_v52, 0.0  ;;  %v810_v3 = vpop.permute.xlu1 %809 }
 0x2c8   :  { %v990_v1 = vpop.f32.mrf.mxu1  ;;  %v895_v11 = vmul.f32 -1.442695, %v862_v13 }
 0x2c9   :  { %v834_v56 = vadd.f32 %v833_v6, %v819_v43  ;;  %v740_v57 = vmax.f32 %v704_v53, 0.0  ;;  %v725_v2 = vadd.f32 %v990_v1, %v580_v61  ;;  %v823_v50 = vmul.f32 %v794_v23, %v742_v60 }
 0x2ca   :  { %v716_v58 = vpop.f32.mrf.mxu1  ;;  %1049 = vpow2.f32 %v895_v11 }
 0x2cb   :  { %v835_v44 = vadd.f32 %v834_v56, %v820_v55  ;;  %v821_v45 = vmul.f32 %v1387_v51, %v740_v57  ;;  %v717_v48 = vadd.f32 %v716_v58, %v1389_v27  ;;  %v745_v21 = vmax.f32 %v725_v2, 0.0 }
 0x2cc   :  { %v991_v62 = vpop.f32.mrf.mxu1 }
 0x2cd   :  { %v836_v63 = vadd.f32 %v835_v44, %v821_v45  ;;  %v743_v46 = vmax.f32 %v717_v48, 0.0  ;;  %v728_v20 = vadd.f32 %v991_v62, %v584_v47  ;;  %v826_v28 = vmul.f32 %v806_v7, %v745_v21 }
 0x2ce   :  { %v719_v18 = vpop.f32.mrf.mxu1 }
 0x2cf   :  { %v837_v19 = vadd.f32 %v836_v63, %v822_v49  ;;  %v720_v30 = vadd.f32 %v719_v18, %v1391_v59  ;;  %v824_v51 = vmul.f32 %v798_v12, %v743_v46  ;;  %v746_v25 = vmax.f32 %v728_v20, 0.0 }
 0x2d0   :  { %v849_v12 = vstv %s747_s7 }
 0x2d1   :  { %v744_v22 = vmax.f32 %v720_v30, 0.0  ;;  %v838_v27 = vadd.f32 %v837_v19, %v823_v50  ;;  %v827_v14 = vmul.f32 %v810_v3, %v746_v25 }
 0x2d3   :  { %v825_v26 = vmul.f32 %v802_v0, %v744_v22  ;;  %v839_v9 = vadd.f32 %v838_v27, %v824_v51 }
 0x2d5   :  { %v840_v31 = vadd.f32 %v839_v9, %v825_v26 }
 0x2d7   :  { %v841_v16 = vadd.f32 %v840_v31, %v826_v28  ;;  %v1050_v36 = vpop.eup %1049 }
 0x2d8   :  { %v866_v37 = vadd.f32 1.0, %v1050_v36 }
 0x2d9   :  { %v842_v23 = vadd.f32 %v841_v16, %v827_v14 }
 0x2db   :  { %v843_v59 = vrot.slane %v842_v23, 4 }
 0x2dd   :  { %v844_v32 = vadd.f32 %v843_v59, %v842_v23 }
 0x2df   :  { %v845_v33 = vrot.slane %v844_v32, 2 }
 0x2e1   :  { %v846_v24 = vadd.f32 %v845_v33, %v844_v32 }
 0x2e3   :  { %v847_v15 = vrot.slane %v846_v24, 1 }
 0x2e5   :  { %v848_v34 = vadd.f32 %v847_v15, %v846_v24 }
 0x2e7   :  { %v850_v4 = vadd.f32 %v849_v12, %v848_v34 }
 0x2e9   :  { %v892_v35 = vmul.f32 -1.442695, %v850_v4 }
 0x2eb   :  { %1051 = vpow2.f32 %v892_v35 }
 0x2ec   :  { %1053 = vrcp.f32 %v866_v37 }
 0x2f8   :  { %v1052_v10 = vpop.eup %1051 }
 0x2f9   :  { %v854_v38 = vadd.f32 1.0, %v1052_v10  ;;  %v1054_v29 = vpop.eup %1053 }
 0x2fb   :  { %1055 = vrcp.f32 %v854_v38 }
 0x308   :  { %v1056_v39 = vpop.eup %1055 }
 0x309   :  { %v869_v40 = vmul.f32 %v1056_v39, %v1054_v29 }
 0x30b   :  { %870 = vst [vmem:[%s1406_s5] sm:$0x1] %v869_v40 }
 0x30c   :  { %875 = vsyncpa [#allocation3], 1 }

</bundles_post_ra>
